<compile_context>
chip_gen: v7x
topology: tpu7x:2x2x1
jax: 0.10.0
libtpu: 0.0.40
codegen_flags: <defaults>
</compile_context>

<pallas_src>
import functools

import jax
import jax.numpy as jnp
from jax.experimental import pallas as pl
from jax.experimental.pallas import tpu as pltpu

COEFF = 0.95
_HALO = 128  # minimum lane-aligned halo width


def _pe_single_tile_kernel(x_ref, tgt_ref, yp_ref, y_ref, *, coeff):
    """Whole T in one tile: no halo, no carry."""
    def filt(in_ref, out_ref):
        v = in_ref[...]
        c = jnp.asarray(coeff, v.dtype)
        out_ref[...] = v - c * pltpu.roll(v, shift=1, axis=1)
        # roll wrapped column 0 around the tile; the true semantics is pass-through.
        out_ref[:, :1] = v[:, :1]

    filt(x_ref, yp_ref)
    filt(tgt_ref, y_ref)


def _pe_halo_kernel(x_ref, tgt_ref, xh_ref, th_ref, yp_ref, y_ref, *, coeff):
    """Multiple T tiles: predecessor of column 0 comes from a 128-lane halo block."""
    first_t = pl.program_id(1) == 0

    def filt(in_ref, halo_ref, out_ref):
        v = in_ref[...]
        c = jnp.asarray(coeff, v.dtype)
        out_ref[...] = v - c * pltpu.roll(v, shift=1, axis=1)
        # Column 0's true predecessor is the last sample of the previous T tile
        # (last lane of the halo block), or nothing at the first tile.
        prev_last = halo_ref[:, _HALO - 1:_HALO]
        prev0 = jnp.where(first_t, jnp.zeros_like(prev_last), prev_last)
        out_ref[:, :1] = v[:, :1] - c * prev0

    filt(x_ref, xh_ref, yp_ref)
    filt(tgt_ref, th_ref, y_ref)


def _cdiv(a, b):
    return -(-a // b)


def _round_up(n, m):
    return _cdiv(n, m) * m


def _default_budgets():
    """(target_block_bytes, vmem_limit_bytes) sized to this chip's VMEM."""
    try:
        cap = pltpu.get_tpu_info().vmem_capacity_bytes
    except Exception:
        cap = 64 * 1024 * 1024  # conservative fallback (v7x-sized)
    if cap >= 100 * 1024 * 1024:          # v5e / v6e: 128 MiB physical VMEM
        return 8 * 1024 * 1024, 96 * 1024 * 1024
    return 3 * 1024 * 1024, 48 * 1024 * 1024  # v7x: 64 MiB physical VMEM


def pre_emphasis_filter(x, target, coeff=COEFF, *,
                        target_block_bytes=None, vmem_limit_bytes=None,
                        r_tile=None, t_tile=None):
    """x, target: (B, C, T). Returns (y_pred, y) with the same shapes."""
    assert x.shape == target.shape and x.dtype == target.dtype
    B, C, T = x.shape
    rows = B * C
    itemsize = jnp.dtype(x.dtype).itemsize
    sub = max(8, 32 // itemsize)          # sublane multiple: 8 f32 / 16 bf16 / 32 i8

    tbb_default, vmem_default = _default_budgets()
    target_block_bytes = target_block_bytes or tbb_default
    vmem_limit_bytes = vmem_limit_bytes or vmem_default

    rows_al = _round_up(rows, sub)
    t128 = _round_up(T, 128)
    budget = max(sub * 128, target_block_bytes // itemsize)   # elems per block

    # Joint tile solve: lane (T) tile as large as the budget allows alongside at
    # least `sub` rows; row tile then fills the remaining budget.
    if t_tile is None:
        t_tile = T if (budget // sub) >= t128 else max(128, (budget // sub) // 128 * 128)
    if r_tile is None:
        r_tile = min(rows_al, max(sub, (budget // max(t_tile, 1)) // sub * sub))
    assert r_tile % sub == 0

    r_grid = _cdiv(rows, r_tile)
    t_grid = 1 if t_tile >= T else _cdiv(T, t_tile)

    # v7x has 2 TensorCores: if everything collapsed into a single grid point but
    # the data is big enough to care, split one parallel axis so both cores work.
    if r_grid * t_grid == 1 and rows * T * itemsize >= (2 << 20):
        if rows_al >= 2 * sub:
            r_tile = _round_up(_cdiv(rows_al, 2), sub)
            r_grid = _cdiv(rows, r_tile)
        elif T >= 256:
            t_tile = _round_up(_cdiv(T, 2), 128)
            t_grid = _cdiv(T, t_tile)

    single_t = t_grid == 1
    if single_t:
        t_tile = T                          # full-dim block (no 128 alignment needed)
    else:
        assert t_tile % 128 == 0, "multi-tile T requires a 128-multiple t_tile"

    x2 = x.reshape(rows, T)
    t2 = target.reshape(rows, T)
    out_sds = jax.ShapeDtypeStruct((rows, T), x.dtype)

    cost = pl.CostEstimate(flops=4 * rows * T, transcendentals=0,
                           bytes_accessed=4 * rows * T * itemsize)

    if single_t:
        spec = pl.BlockSpec((r_tile, T), lambda r: (r, 0))
        yp, y = pl.pallas_call(
            functools.partial(_pe_single_tile_kernel, coeff=coeff),
            out_shape=(out_sds, out_sds),
            grid=(r_grid,),
            in_specs=[spec, spec],
            out_specs=[spec, spec],
            compiler_params=pltpu.CompilerParams(
                dimension_semantics=("parallel",),
                vmem_limit_bytes=vmem_limit_bytes),
            cost_estimate=cost,
        )(x2, t2)
    else:
        hb = t_tile // 128                  # 128-wide blocks per T tile
        main = pl.BlockSpec((r_tile, t_tile), lambda r, t: (r, t))
        halo = pl.BlockSpec((r_tile, _HALO),
                            lambda r, t: (r, jnp.maximum(t * hb - 1, 0)))
        yp, y = pl.pallas_call(
            functools.partial(_pe_halo_kernel, coeff=coeff),
            out_shape=(out_sds, out_sds),
            grid=(r_grid, t_grid),
            in_specs=[main, main, halo, halo],
            out_specs=[main, main],
            compiler_params=pltpu.CompilerParams(
                dimension_semantics=("parallel", "parallel"),
                vmem_limit_bytes=vmem_limit_bytes),
            cost_estimate=cost,
        )(x2, t2, x2, t2)

    return yp.reshape(B, C, T), y.reshape(B, C, T)


def _reference(x, target, coeff=COEFF):
    def f(a):
        return jnp.concatenate([a[..., :1], a[..., 1:] - coeff * a[..., :-1]], axis=-1)
    return f(x), f(target)


def _check(got, want, msg):
    gp, gy = got
    wp, wy = want
    assert jnp.allclose(gp, wp, atol=1e-6, rtol=1e-6), msg + " (y_pred mismatch)"
    assert jnp.allclose(gy, wy, atol=1e-6, rtol=1e-6), msg + " (y mismatch)"


if __name__ == "__main__":
    key = jax.random.PRNGKey(0)
    k1, k2, k3, k4, k5, k6 = jax.random.split(key, 6)

    # Test 1: small audio-like shape, single-T-tile fast path.
    B, C, T = 2, 4, 128
    x = jax.random.normal(k1, (B, C, T), dtype=jnp.float32)
    tgt = jax.random.normal(k2, (B, C, T), dtype=jnp.float32)
    out = pre_emphasis_filter(x, tgt)
    jax.block_until_ready(out)
    _check(out, _reference(x, tgt), "test1")

    # Test 2: multi-T-tile halo path, ragged row block (rows=6 < sublane tile 8).
    B2, C2, T2 = 2, 3, 384
    x2 = jax.random.normal(k3, (B2, C2, T2), dtype=jnp.float32)
    tgt2 = jax.random.normal(k4, (B2, C2, T2), dtype=jnp.float32)
    out2 = pre_emphasis_filter(x2, tgt2, t_tile=128)
    jax.block_until_ready(out2)
    _check(out2, _reference(x2, tgt2), "test2")

    # Test 3: ragged T tail (T=200 with 128-wide tiles) + ragged row grid (rows=10).
    B3, C3, T3 = 2, 5, 200
    x3 = jax.random.normal(k5, (B3, C3, T3), dtype=jnp.float32)
    tgt3 = jax.random.normal(k6, (B3, C3, T3), dtype=jnp.float32)
    out3 = pre_emphasis_filter(x3, tgt3, r_tile=8, t_tile=128)
    jax.block_until_ready(out3)
    _check(out3, _reference(x3, tgt3), "test3")

    print("KERNEL_OK")
</pallas_src>

<mosaic_0001>
module attributes {stable_mosaic.version = 11 : i64} {
  func.func @_pe_single_tile_kernel(%arg0: i32, %arg1: memref<8x128xf32, #tpu.memory_space<vmem>>, %arg2: memref<8x128xf32, #tpu.memory_space<vmem>>, %arg3: memref<8x128xf32, #tpu.memory_space<vmem>>, %arg4: memref<8x128xf32, #tpu.memory_space<vmem>>) attributes {dimension_semantics = [#tpu.dimension_semantics<parallel>], iteration_bounds = array<i64: 1>, scalar_prefetch = 0 : i64, scratch_operands = 0 : i64, tpu.core_type = #tpu.core_type<tc>, window_params = [{transform_indices = @transform_0, window_bounds = array<i64: 8, 128>}, {transform_indices = @transform_1, window_bounds = array<i64: 8, 128>}, {transform_indices = @transform_2, window_bounds = array<i64: 8, 128>}, {transform_indices = @transform_3, window_bounds = array<i64: 8, 128>}]} {
    %c0 = arith.constant 0 : index
    %c0_0 = arith.constant 0 : index
    %0 = vector.load %arg1[%c0, %c0_0] : memref<8x128xf32, #tpu.memory_space<vmem>>, vector<8x128xf32>
    %c1_i32 = arith.constant 1 : i32
    %1 = tpu.dynamic_rotate %0 by %c1_i32 dim 1 : vector<8x128xf32>, i32 -> vector<8x128xf32>
    %cst = arith.constant 0.949999988 : f32
    %2 = vector.broadcast %cst : f32 to vector<8x128xf32>
    %3 = arith.mulf %2, %1 : vector<8x128xf32>
    %4 = arith.subf %0, %3 : vector<8x128xf32>
    %c0_1 = arith.constant 0 : index
    %c0_2 = arith.constant 0 : index
    %5 = vector.load %arg3[%c0_1, %c0_2] : memref<8x128xf32, #tpu.memory_space<vmem>>, vector<8x128xf32>
    tpu.vector_store %arg3[%c0_1, %c0_2], %4 {strides = array<i32>} : memref<8x128xf32, #tpu.memory_space<vmem>>, vector<8x128xf32>,
    %6 = vector.extract_strided_slice %0 {offsets = [0, 0], sizes = [8, 1], strides = [1, 1]} : vector<8x128xf32> to vector<8x1xf32>
    %c0_3 = arith.constant 0 : index
    %c0_4 = arith.constant 0 : index
    %7 = vector.load %arg3[%c0_3, %c0_4] : memref<8x128xf32, #tpu.memory_space<vmem>>, vector<8x1xf32>
    tpu.vector_store %arg3[%c0_3, %c0_4], %6 {strides = array<i32>} : memref<8x128xf32, #tpu.memory_space<vmem>>, vector<8x1xf32>,
    %c0_5 = arith.constant 0 : index
    %c0_6 = arith.constant 0 : index
    %8 = vector.load %arg2[%c0_5, %c0_6] : memref<8x128xf32, #tpu.memory_space<vmem>>, vector<8x128xf32>
    %c1_i32_7 = arith.constant 1 : i32
    %9 = tpu.dynamic_rotate %8 by %c1_i32_7 dim 1 : vector<8x128xf32>, i32 -> vector<8x128xf32>
    %cst_8 = arith.constant 0.949999988 : f32
    %10 = vector.broadcast %cst_8 : f32 to vector<8x128xf32>
    %11 = arith.mulf %10, %9 : vector<8x128xf32>
    %12 = arith.subf %8, %11 : vector<8x128xf32>
    %c0_9 = arith.constant 0 : index
    %c0_10 = arith.constant 0 : index
    %13 = vector.load %arg4[%c0_9, %c0_10] : memref<8x128xf32, #tpu.memory_space<vmem>>, vector<8x128xf32>
    tpu.vector_store %arg4[%c0_9, %c0_10], %12 {strides = array<i32>} : memref<8x128xf32, #tpu.memory_space<vmem>>, vector<8x128xf32>,
    %14 = vector.extract_strided_slice %8 {offsets = [0, 0], sizes = [8, 1], strides = [1, 1]} : vector<8x128xf32> to vector<8x1xf32>
    %c0_11 = arith.constant 0 : index
    %c0_12 = arith.constant 0 : index
    %15 = vector.load %arg4[%c0_11, %c0_12] : memref<8x128xf32, #tpu.memory_space<vmem>>, vector<8x1xf32>
    tpu.vector_store %arg4[%c0_11, %c0_12], %14 {strides = array<i32>} : memref<8x128xf32, #tpu.memory_space<vmem>>, vector<8x1xf32>,
    return
  }
  func.func @transform_0(%arg0: i32) -> (i32, i32) {
    %c0_i32 = arith.constant 0 : i32
    %c0_i32_0 = arith.constant 0 : i32
    return %arg0, %c0_i32 : i32, i32
  }
  func.func @transform_1(%arg0: i32) -> (i32, i32) {
    %c0_i32 = arith.constant 0 : i32
    %c0_i32_0 = arith.constant 0 : i32
    return %arg0, %c0_i32 : i32, i32
  }
  func.func @transform_2(%arg0: i32) -> (i32, i32) {
    %c0_i32 = arith.constant 0 : i32
    %c0_i32_0 = arith.constant 0 : i32
    return %arg0, %c0_i32 : i32, i32
  }
  func.func @transform_3(%arg0: i32) -> (i32, i32) {
    %c0_i32 = arith.constant 0 : i32
    %c0_i32_0 = arith.constant 0 : i32
    return %arg0, %c0_i32 : i32, i32
  }
}

</mosaic_0001>

<bundles_post_ra>
// kernel: tpu_custom_call.1
= control target key start
LH: loop header
LB: loop body
LE: loop exit
PB: predicated region body
PF: predicated region fallthrough
CT: control target
= control target key end

     0   :  { %9 = vsyncpa [#allocation3], 0  ;;  %s260_s0 = inlined_call_operand.hbm [shape: f32[8,128], index: 0, kind: input, shape index: {}]   ;;  %s261_s1 = inlined_call_operand.hbm [shape: f32[8,128], index: 1, kind: input, shape index: {}]   ;;  %s262_s2 = inlined_call_operand.hbm [shape: f32[8,128], index: 2, kind: output, shape index: {0}]   ;;  %s263_s3 = inlined_call_operand.hbm [shape: f32[8,128], index: 3, kind: output, shape index: {1}]  }
   0x1   :  { %10 = vsyncpa [#allocation6], 0 }
   0x2   :  { %11 = vsyncpa [#allocation4], 0 }
   0x3   :  { %12 = vsyncpa [#allocation9], 0  ;;  %s185_s12 = smov [#allocation2]   ;;  %s186_s14 = smov [#allocation5]  }
   0x4   :  { %s19_s13 = sshll.u32 %s185_s12, 4  ;;  %s29_s15 = sshll.u32 %s186_s14, 4  ;;  %s20_s13 = int_to_ptr.vmem [resolvable:$true] %s19_s13  ;;  %s30_s15 = int_to_ptr.vmem [resolvable:$true] %s29_s15 }
   0x5   :  { %s89_s18 = scalar_lea.hbm %s260_s0, 128 }
   0x6   :  { %p90_p0 = scmp.ne.s32.totalorder %s260_s0, %s89_s18  ;;  %p93_p1 = scmp.lt.u32.totalorder %s89_s18, %s260_s0 }
   0x8   :  { %p95_p2 = pnand %p93_p1, %p90_p0 }
   0xa   :  { %98 = shalt.err (!%p95_p2)
}
   0xb   :  { %s99_s23 = scalar_lea.vmem %s20_s13, 128  ;;  %p104_p4 = scmp.lt.s32.totalorder %s20_s13, %s20_s13 }
   0xc   :  { %p100_p3 = scmp.ne.s32.totalorder %s20_s13, %s99_s23  ;;  %p105_p5 = scmp.lt.s32.totalorder %s99_s23, %s99_s23 }
   0xe   :  { %p106_p6 = por %p105_p5, %p104_p4 }
  0x10   :  { %p107_p7 = pnand %p106_p6, %p100_p3 }
  0x12   :  { %110 = shalt.err (!%p107_p7)
}
  0x13   :  { %22 = dma.hbm_to_vmem [thread:$0]  %s260_s0, 128, %s20_s13, [#allocation3]  }
  0x14   :  { %s111_s28 = scalar_lea.hbm %s261_s1, 128 }
  0x15   :  { %p112_p8 = scmp.ne.s32.totalorder %s261_s1, %s111_s28  ;;  %p115_p9 = scmp.lt.u32.totalorder %s111_s28, %s261_s1 }
  0x17   :  { %p117_p10 = pnand %p115_p9, %p112_p8 }
  0x19   :  { %120 = shalt.err (!%p117_p10)
}
  0x1a   :  { %s121_s6 = scalar_lea.vmem %s30_s15, 128  ;;  %p126_p12 = scmp.lt.s32.totalorder %s30_s15, %s30_s15 }
  0x1b   :  { %p122_p11 = scmp.ne.s32.totalorder %s30_s15, %s121_s6  ;;  %p127_p13 = scmp.lt.s32.totalorder %s121_s6, %s121_s6 }
  0x1d   :  { %p128_p0 = por %p127_p13, %p126_p12 }
  0x1f   :  { %p129_p1 = pnand %p128_p0, %p122_p11 }
  0x21   :  { %132 = shalt.err (!%p129_p1)
}
  0x22   :  { %32 = dma.hbm_to_vmem [thread:$0]  %s261_s1, 128, %s30_s15, [#allocation6]  }
  0x23   :  { %177 = dma.done.wait [#allocation3], 128  }
  0x24   :  { %178 = vsyncadd [#allocation3], 4294967168 }
  0x25   :  { %179 = dma.done.wait [#allocation6], 128  }
  0x26   :  { %180 = vsyncadd [#allocation6], 4294967168  ;;  %v39_v0 = vld [vmem:[#allocation2] sm:$0xff]  ;;  %s187_s8 = smov 1   ;;  %v47_v1 = vld [vmem:[#allocation5] sm:$0xff]  ;;  %s188_s9 = smov [#allocation7]  }
  0x27   :  { %40 = vrot.lane.b32.xlu0 %v39_v0, %s187_s8  ;;  %s60_s10 = sshll.u32 %s188_s9, 4  ;;  %vm45_vm0 = vcmask 7168   ;;  %s189_s1 = smov [#allocation8]   ;;  %s61_s10 = int_to_ptr.vmem [resolvable:$true] %s60_s10 }
  0x28   :  { %s70_s11 = sshll.u32 %s189_s1, 4  ;;  %s133_s12 = scalar_lea.vmem %s61_s10, 128  ;;  %s71_s11 = int_to_ptr.vmem [resolvable:$true] %s70_s11 }
  0x29   :  { %p134_p2 = scmp.ne.s32.totalorder %s61_s10, %s133_s12  ;;  %p138_p3 = scmp.lt.s32.totalorder %s61_s10, %s61_s10 }
  0x2a   :  { %p139_p4 = scmp.lt.s32.totalorder %s133_s12, %s133_s12 }
  0x2b   :  { %48 = vrot.lane.b32.xlu0 %v47_v1, %s187_s8 }
  0x2c   :  { %p140_p5 = por %p139_p4, %p138_p3 }
  0x2e   :  { %p141_p6 = pnand %p140_p5, %p134_p2 }
  0x99   :  { %v41_v2 = vpop.permute.xlu0 %40 }
  0x9a   :  { %v42_v3 = vmul.f32 0.95, %v41_v2 }
  0x9c   :  { %v43_v4 = vsub.f32 %v39_v0, %v42_v3 }
  0x9d   :  { %v49_v5 = vpop.permute.xlu0 %48 }
  0x9e   :  { %44 = vst [vmem:[#allocation7] sm:$0xff] %v43_v4  ;;  %v50_v6 = vmul.f32 0.95, %v49_v5 }
  0x9f   :  { %46 = vst.msk [vmem:[#allocation7] sm:$0xff] %vm45_vm0, %v39_v0 }
  0xa0   :  { %v51_v7 = vsub.f32 %v47_v1, %v50_v6 }
  0xa1   :  { %144 = shalt.err (!%p141_p6)
}
  0xa2   :  { %s145_s15 = scalar_lea.hbm %s262_s2, 128 }
  0xa3   :  { %p146_p7 = scmp.ne.s32.totalorder %s262_s2, %s145_s15  ;;  %p149_p8 = scmp.lt.u32.totalorder %s145_s15, %s262_s2 }
  0xa5   :  { %p151_p9 = pnand %p149_p8, %p146_p7 }
  0xa7   :  { %154 = shalt.err (!%p151_p9)
}
  0xa8   :  { %63 = dma.vmem_to_hbm [thread:$0]  %s61_s10, 128, %s262_s2, [#allocation4]   ;;  %52 = vst [vmem:[#allocation8] sm:$0xff] %v51_v7 }
  0xa9   :  { %53 = vst.msk [vmem:[#allocation8] sm:$0xff] %vm45_vm0, %v47_v1  ;;  %s155_s22 = scalar_lea.vmem %s71_s11, 128  ;;  %p160_p11 = scmp.lt.s32.totalorder %s71_s11, %s71_s11 }
  0xaa   :  { %p156_p10 = scmp.ne.s32.totalorder %s71_s11, %s155_s22  ;;  %p161_p12 = scmp.lt.s32.totalorder %s155_s22, %s155_s22 }
  0xac   :  { %p162_p13 = por %p161_p12, %p160_p11 }
  0xae   :  { %p163_p0 = pnand %p162_p13, %p156_p10 }
  0xb0   :  { %166 = shalt.err (!%p163_p0)
}
  0xb1   :  { %s167_s25 = scalar_lea.hbm %s263_s3, 128 }
  0xb2   :  { %p168_p1 = scmp.ne.s32.totalorder %s263_s3, %s167_s25  ;;  %p171_p2 = scmp.lt.u32.totalorder %s167_s25, %s263_s3 }
  0xb4   :  { %p173_p3 = pnand %p171_p2, %p168_p1 }
  0xb6   :  { %176 = shalt.err (!%p173_p3)
}
  0xb7   :  { %73 = dma.vmem_to_hbm [thread:$0]  %s71_s11, 128, %s263_s3, [#allocation9]  }
  0xb8   :  { %181 = dma.done.wait [#allocation4], 128  }
  0xb9   :  { %182 = vsyncadd [#allocation4], 4294967168 }
  0xba   :  { %183 = dma.done.wait [#allocation9], 128  }
  0xbb   :  { %184 = vsyncadd [#allocation9], 4294967168 }
  0xbc   :  { %80 = vsyncpa [#allocation3], 1 }
  0xbd   :  { %81 = vsyncpa [#allocation6], 1 }
  0xbe   :  { %82 = vsyncpa [#allocation4], 1 }
  0xbf   :  { %83 = vsyncpa [#allocation9], 1 }

</bundles_post_ra>
